<compile_context>
chip_gen: v6e
topology: v6e:2x2x1
jax: 0.10.0
libtpu: 0.0.40
codegen_flags: <defaults>
</compile_context>

<pallas_src>
import jax
import jax.numpy as jnp
from jax.experimental import pallas as pl
from jax.experimental.pallas import tpu as pltpu

EPS = 1e-5


def lnn2_kernel(x_ref, w2t_ref, w1s_ref, bias_ref, o_ref):
    # x_ref:    (B, input_size)        one minibatch (leading grid dim squeezed)
    # w2t_ref:  (input_size, width)    == linear_2.weight.T            (resident)
    # w1s_ref:  (output_dim, width)    == gamma[None, :] * linear_1.weight (resident)
    # bias_ref: (1, output_dim)        == linear_1.weight @ beta       (resident)
    # o_ref:    (B, output_dim)
    x = x_ref[...].astype(jnp.float32)          # cast inside the kernel
    w2t = w2t_ref[...]
    b, input_size = x.shape

    # ---- linear_2: K is tiny -> VPU broadcast multiply-adds, skip the MXU.
    if input_size <= 8:
        h = x[:, 0:1] * w2t[0:1, :]
        for k in range(1, input_size):
            h = h + x[:, k:k + 1] * w2t[k:k + 1, :]
    else:
        h = jnp.dot(x, w2t, preferred_element_type=jnp.float32)        # (B, width)

    # ---- BatchNorm1d, two-pass batch statistics (biased variance).
    inv_n = 1.0 / b
    mean = jnp.sum(h, axis=0, keepdims=True) * inv_n                   # (1, width)
    centered = h - mean
    var = jnp.sum(centered * centered, axis=0, keepdims=True) * inv_n  # (1, width)
    h_norm = centered * jax.lax.rsqrt(var + EPS)                       # (B, width)

    # ---- linear_1 (gamma folded into w1s, beta folded into bias).
    if w1s_ref.shape[0] == 1:
        # output_dim == 1: lane-wise multiply + cross-lane sum (VPU + XLU).
        o = jnp.sum(h_norm * w1s_ref[...], axis=-1, keepdims=True)     # (B, 1)
    else:
        o = jax.lax.dot_general(h_norm, w1s_ref[...],
                                (((1,), (1,)), ((), ())),
                                preferred_element_type=jnp.float32)    # (B, output_dim)

    o_ref[...] = (o + bias_ref[...]).astype(o_ref.dtype)


def prepare_lnn2_params(w2, gamma, beta, w1):
    """One-time parameter preprocessing (NOT in the per-call path).

    w2: (width, input_size)  == linear_2.weight
    w1: (output_dim, width)  == linear_1.weight
    gamma, beta: (width,)    == bn_1.weight / bn_1.bias
    """
    w2 = jnp.asarray(w2, jnp.float32)
    w1 = jnp.asarray(w1, jnp.float32)
    gamma = jnp.asarray(gamma, jnp.float32)
    beta = jnp.asarray(beta, jnp.float32)

    width = w2.shape[0]
    output_dim = w1.shape[0]

    w2t = w2.T                               # (input_size, width)
    w1s = gamma[None, :] * w1                # (output_dim, width), gamma folded
    bias = (w1 @ beta)[None, :]              # (1, output_dim),      beta folded

    return {"w2t": w2t, "w1s": w1s, "bias": bias,
            "width": width, "output_dim": output_dim}


def lnn2_forward_batched(x_batches, params):
    """x_batches: (NB, B, ...) stacked minibatches. BN stats are per-minibatch,
    so each grid step is independent. Returns (NB, B, output_dim)."""
    nb, b = x_batches.shape[0], x_batches.shape[1]
    x3d = x_batches.reshape(nb, b, -1)       # nn.Flatten (free if contiguous)
    input_size = x3d.shape[2]
    width = params["width"]
    output_dim = params["output_dim"]

    return pl.pallas_call(
        lnn2_kernel,
        out_shape=jax.ShapeDtypeStruct((nb, b, output_dim), jnp.float32),
        grid=(nb,),
        in_specs=[
            pl.BlockSpec((None, b, input_size), lambda i: (i, 0, 0)),   # per-step
            pl.BlockSpec((input_size, width), lambda i: (0, 0)),        # resident
            pl.BlockSpec((output_dim, width), lambda i: (0, 0)),        # resident
            pl.BlockSpec((1, output_dim), lambda i: (0, 0)),            # resident
        ],
        out_specs=pl.BlockSpec((None, b, output_dim), lambda i: (i, 0, 0)),
        compiler_params=pltpu.CompilerParams(
            dimension_semantics=("parallel",)),   # shards across v7x's 2 TCs
    )(x3d, params["w2t"], params["w1s"], params["bias"])


def lnn2_forward(x, params):
    """Single-minibatch convenience wrapper: x (B, ...) -> (B, output_dim)."""
    return lnn2_forward_batched(x[None], params)[0]


def reference_forward(x, w2, gamma, beta, w1):
    """Un-folded per-minibatch reference reproducing the PyTorch module math."""
    b = x.shape[0]
    x2d = x.reshape(b, -1).astype(jnp.float32)
    h = x2d @ w2.T
    mean = jnp.mean(h, axis=0, keepdims=True)
    var = jnp.mean((h - mean) ** 2, axis=0, keepdims=True)   # biased variance
    h = (h - mean) / jnp.sqrt(var + EPS)
    h = h * gamma[None, :] + beta[None, :]
    return h @ w1.T


if __name__ == "__main__":
    # Shapes consistent with the module (input_size=2, output_dim=1, args.width=32).
    num_batches = 4
    batch = 8
    input_size = 2
    width = 32
    output_dim = 1

    key = jax.random.PRNGKey(0)
    kx, kw2, kw1, kg, kb = jax.random.split(key, 5)

    x = jax.random.normal(kx, (num_batches, batch, input_size), dtype=jnp.float32)
    w2 = jax.random.normal(kw2, (width, input_size), dtype=jnp.float32) * 0.5   # linear_2.weight
    w1 = jax.random.normal(kw1, (output_dim, width), dtype=jnp.float32) * 0.5   # linear_1.weight
    gamma = 1.0 + 0.1 * jax.random.normal(kg, (width,), dtype=jnp.float32)      # bn_1.weight
    beta = 0.1 * jax.random.normal(kb, (width,), dtype=jnp.float32)             # bn_1.bias

    # One-time parameter preparation (outside the per-call path).
    params = prepare_lnn2_params(w2, gamma, beta, w1)
    params = {k: (jax.block_until_ready(v) if isinstance(v, jnp.ndarray) else v)
              for k, v in params.items()}

    # Batched path: NB minibatches in one pallas_call (weights VMEM-resident).
    out = lnn2_forward_batched(x, params)
    out = jax.block_until_ready(out)

    # Single-minibatch path.
    out0 = jax.block_until_ready(lnn2_forward(x[0], params))

    ref = jnp.stack([reference_forward(x[i], w2, gamma, beta, w1)
                     for i in range(num_batches)], axis=0)

    assert out.shape == (num_batches, batch, output_dim), out.shape
    assert jnp.allclose(out, ref, atol=1e-4, rtol=1e-4), (out, ref)
    assert jnp.allclose(out0, ref[0], atol=1e-4, rtol=1e-4), (out0, ref[0])

    print("KERNEL_OK")
</pallas_src>

<mosaic_0001>
module attributes {stable_mosaic.version = 11 : i64} {
  func.func @lnn2_kernel(%arg0: i32, %arg1: memref<1x8x2xf32, #tpu.memory_space<vmem>>, %arg2: memref<2x32xf32, #tpu.memory_space<vmem>>, %arg3: memref<1x32xf32, #tpu.memory_space<vmem>>, %arg4: memref<1x1xf32, #tpu.memory_space<vmem>>, %arg5: memref<1x8x1xf32, #tpu.memory_space<vmem>>) attributes {dimension_semantics = [#tpu.dimension_semantics<parallel>], iteration_bounds = array<i64: 4>, scalar_prefetch = 0 : i64, scratch_operands = 0 : i64, tpu.core_type = #tpu.core_type<tc>, window_params = [{transform_indices = @transform_0, window_bounds = array<i64: 1, 8, 2>}, {pipeline_mode = #tpu.pipeline_mode<synchronous>, transform_indices = @transform_1, window_bounds = array<i64: 2, 32>}, {pipeline_mode = #tpu.pipeline_mode<synchronous>, transform_indices = @transform_2, window_bounds = array<i64: 1, 32>}, {pipeline_mode = #tpu.pipeline_mode<synchronous>, transform_indices = @transform_3, window_bounds = array<i64: 1, 1>}, {transform_indices = @transform_4, window_bounds = array<i64: 1, 8, 1>}]} {
    %c0 = arith.constant 0 : index
    %c0_0 = arith.constant 0 : index
    %c0_1 = arith.constant 0 : index
    %0 = vector.load %arg1[%c0, %c0_0, %c0_1] : memref<1x8x2xf32, #tpu.memory_space<vmem>>, vector<1x8x2xf32>
    %1 = vector.shape_cast %0 : vector<1x8x2xf32> to vector<8x2xf32>
    %c0_2 = arith.constant 0 : index
    %c0_3 = arith.constant 0 : index
    %2 = vector.load %arg2[%c0_2, %c0_3] : memref<2x32xf32, #tpu.memory_space<vmem>>, vector<2x32xf32>
    %3 = vector.extract_strided_slice %1 {offsets = [0, 0], sizes = [8, 1], strides = [1, 1]} : vector<8x2xf32> to vector<8x1xf32>
    %4 = vector.extract_strided_slice %2 {offsets = [0, 0], sizes = [1, 32], strides = [1, 1]} : vector<2x32xf32> to vector<1x32xf32>
    %5 = vector.broadcast %3 : vector<8x1xf32> to vector<8x32xf32>
    %6 = vector.broadcast %4 : vector<1x32xf32> to vector<8x32xf32>
    %7 = arith.mulf %5, %6 : vector<8x32xf32>
    %8 = vector.extract_strided_slice %1 {offsets = [0, 1], sizes = [8, 1], strides = [1, 1]} : vector<8x2xf32> to vector<8x1xf32>
    %9 = vector.extract_strided_slice %2 {offsets = [1, 0], sizes = [1, 32], strides = [1, 1]} : vector<2x32xf32> to vector<1x32xf32>
    %10 = vector.broadcast %8 : vector<8x1xf32> to vector<8x32xf32>
    %11 = vector.broadcast %9 : vector<1x32xf32> to vector<8x32xf32>
    %12 = arith.mulf %10, %11 : vector<8x32xf32>
    %13 = arith.addf %7, %12 : vector<8x32xf32>
    %cst = arith.constant dense<0.000000e+00> : vector<32xf32>
    %14 = vector.multi_reduction <add>, %13, %cst [0] : vector<8x32xf32> to vector<32xf32>
    %15 = vector.shape_cast %14 : vector<32xf32> to vector<1x32xf32>
    %cst_4 = arith.constant 1.250000e-01 : f32
    %16 = vector.broadcast %cst_4 : f32 to vector<1x32xf32>
    %17 = arith.mulf %15, %16 : vector<1x32xf32>
    %18 = vector.broadcast %17 : vector<1x32xf32> to vector<8x32xf32>
    %19 = arith.subf %13, %18 : vector<8x32xf32>
    %20 = arith.mulf %19, %19 : vector<8x32xf32>
    %cst_5 = arith.constant dense<0.000000e+00> : vector<32xf32>
    %21 = vector.multi_reduction <add>, %20, %cst_5 [0] : vector<8x32xf32> to vector<32xf32>
    %22 = vector.shape_cast %21 : vector<32xf32> to vector<1x32xf32>
    %cst_6 = arith.constant 1.250000e-01 : f32
    %23 = vector.broadcast %cst_6 : f32 to vector<1x32xf32>
    %24 = arith.mulf %22, %23 : vector<1x32xf32>
    %cst_7 = arith.constant 9.99999974E-6 : f32
    %25 = vector.broadcast %cst_7 : f32 to vector<1x32xf32>
    %26 = arith.addf %24, %25 : vector<1x32xf32>
    %27 = math.rsqrt %26 : vector<1x32xf32>
    %28 = vector.broadcast %27 : vector<1x32xf32> to vector<8x32xf32>
    %29 = arith.mulf %19, %28 : vector<8x32xf32>
    %c0_8 = arith.constant 0 : index
    %c0_9 = arith.constant 0 : index
    %30 = vector.load %arg3[%c0_8, %c0_9] : memref<1x32xf32, #tpu.memory_space<vmem>>, vector<1x32xf32>
    %31 = vector.broadcast %30 : vector<1x32xf32> to vector<8x32xf32>
    %32 = arith.mulf %29, %31 : vector<8x32xf32>
    %cst_10 = arith.constant dense<0.000000e+00> : vector<8xf32>
    %33 = vector.multi_reduction <add>, %32, %cst_10 [1] : vector<8x32xf32> to vector<8xf32>
    %34 = vector.shape_cast %33 : vector<8xf32> to vector<8x1xf32>
    %c0_11 = arith.constant 0 : index
    %c0_12 = arith.constant 0 : index
    %35 = vector.load %arg4[%c0_11, %c0_12] : memref<1x1xf32, #tpu.memory_space<vmem>>, vector<1x1xf32>
    %36 = vector.broadcast %35 : vector<1x1xf32> to vector<8x1xf32>
    %37 = arith.addf %34, %36 : vector<8x1xf32>
    %c0_13 = arith.constant 0 : index
    %c0_14 = arith.constant 0 : index
    %c0_15 = arith.constant 0 : index
    %38 = vector.load %arg5[%c0_13, %c0_14, %c0_15] : memref<1x8x1xf32, #tpu.memory_space<vmem>>, vector<1x8x1xf32>
    %39 = vector.shape_cast %38 : vector<1x8x1xf32> to vector<8x1xf32>
    %40 = vector.shape_cast %37 : vector<8x1xf32> to vector<1x8x1xf32>
    tpu.vector_store %arg5[%c0_13, %c0_14, %c0_15], %40 {strides = array<i32>} : memref<1x8x1xf32, #tpu.memory_space<vmem>>, vector<1x8x1xf32>,
    return
  }
  func.func @transform_0(%arg0: i32) -> (i32, i32, i32) {
    %c0_i32 = arith.constant 0 : i32
    %c0_i32_0 = arith.constant 0 : i32
    %c0_i32_1 = arith.constant 0 : i32
    return %arg0, %c0_i32, %c0_i32_0 : i32, i32, i32
  }
  func.func @transform_1(%arg0: i32) -> (i32, i32) {
    %c0_i32 = arith.constant 0 : i32
    %c0_i32_0 = arith.constant 0 : i32
    %c0_i32_1 = arith.constant 0 : i32
    return %c0_i32, %c0_i32_0 : i32, i32
  }
  func.func @transform_2(%arg0: i32) -> (i32, i32) {
    %c0_i32 = arith.constant 0 : i32
    %c0_i32_0 = arith.constant 0 : i32
    %c0_i32_1 = arith.constant 0 : i32
    return %c0_i32, %c0_i32_0 : i32, i32
  }
  func.func @transform_3(%arg0: i32) -> (i32, i32) {
    %c0_i32 = arith.constant 0 : i32
    %c0_i32_0 = arith.constant 0 : i32
    %c0_i32_1 = arith.constant 0 : i32
    return %c0_i32, %c0_i32_0 : i32, i32
  }
  func.func @transform_4(%arg0: i32) -> (i32, i32, i32) {
    %c0_i32 = arith.constant 0 : i32
    %c0_i32_0 = arith.constant 0 : i32
    %c0_i32_1 = arith.constant 0 : i32
    return %arg0, %c0_i32, %c0_i32_0 : i32, i32, i32
  }
}

</mosaic_0001>

<bundles_post_ra>
// kernel: tpu_custom_call.1
= control target key start
LH: loop header
LB: loop body
LE: loop exit
PB: predicated region body
PF: predicated region fallthrough
CT: control target
= control target key end

     0   :  { %s376_s17 = smov 0   ;;  %s409_s0 = inlined_call_operand.vmem [shape: f32[4,8,2], index: 0, kind: input, shape index: {}]   ;;  %s410_s1 = inlined_call_operand.vmem [shape: f32[2,32], index: 1, kind: input, shape index: {}]   ;;  %s411_s2 = inlined_call_operand.vmem [shape: f32[1,32], index: 2, kind: input, shape index: {}]   ;;  %s412_s3 = inlined_call_operand.<no memory space> [shape: f32[1,1], index: 3, kind: input, shape index: {}]   ;;  %s413_s4 = inlined_call_operand.vmem [shape: f32[4,8,1], index: 4, kind: output, shape index: {}]  }
   0x1   :  { %v9_v0 = vstv %s412_s3 }
   0x2   :  { %10 = vst [vmem:[#allocation2] sm:$0x1] %v9_v0 }
   0x3 LB: > { %s313_s18 = sadd.s32 4294967295, %s344_s17   ;;  %p317_p0 = scmp.ge.s32.totalorder %s344_s17, 1  ;;  %s344_s17 = sphi %s376_s17, %s16_s17  }
   0x4   : > { %p163_p1 = scmp.lt.s32.totalorder %s344_s17, 5 }
   0x6   : > { %p164_p2 = pnand %p317_p0, %p163_p1 }
   0x7   : > { %p187_p3 = scmp.lt.s32.totalorder (!%p164_p2), %s313_s18, 3 }
   0x8   : > { %167 = sbr.rel (%p164_p2) target bundleno = 346 (0x15a), region = 36 }
   0xd   : > { %v346_v1 = vmov 0   ;;  %s415_s18 = smov (!%p187_p3, %s313_s18), 3  ;;  %v347_v3 = vmov 1   ;;  %v202_v4 = vlaneseq  ;;  %v196_v8 = vld [vmem:[%s410_s1] sm:$0x3]  ;;  %vm217_vm0 = vcmask 261120  }
   0xe   : > { %334 = vset.pattern.permute.xlu0 %v346_v1  ;;  %s318_s3 = sshll.u32 %s415_s18, 3  ;;  %v320_v36 = vld [vmem:[%s411_s2] ss:$0 sm:$0xff]  ;;  %vm258_vm1 = vcmask 7168  }
   0xf   : > { %s190_s21 = scalar_lea.vmem %s409_s0, %s318_s3  ;;  %v203_v5 = vshrl.u32 %v202_v4, 7  ;;  %v321_v40 = vld [vmem:[#allocation2] ss:$0 sm:$0xff]  ;;  %s194_s28 = scalar_lea.vmem %s413_s4, %s318_s3 }
  0x10   : > { %v195_v2 = vld [vmem:[%s190_s21] sm:$0xff] }
  0x11   : > { %199 = vperm.xlu0 %334, %v195_v2   ;;  %v204_v6 = vsub.s32 0, %v203_v5  ;;  %v213_v7 = vsub.s32 1, %v203_v5 }
  0x13   : > { %v205_v10 = vrot.slane %v196_v8, %v204_v6  ;;  %v214_v11 = vrot.slane %v196_v8, %v213_v7 }
  0x15   : > { %335 = vset.pattern.permute.xlu0 %v347_v3 }
  0x16   : > { %208 = vperm.xlu0 %335, %v195_v2  }
  0x8c   : > { %v200_v9 = vpop.permute.xlu0 %199 }
  0x8d   : > { %v206_v13 = vmul.f32 %v205_v10, %v200_v9 }
  0x91   : > { %v209_v12 = vpop.permute.xlu0 %208 }
  0x92   : > { %v215_v14 = vmul.f32 %v214_v11, %v209_v12 }
  0x94   : > { %v216_v15 = vadd.f32 %v215_v14, %v206_v13 }
  0x96   : > { %v218_v16 = vsel %vm217_vm0, %v216_v15, 0.0 }
  0x97   : > { %v219_v17 = vrot.slane %v218_v16, 4 }
  0x99   : > { %v220_v18 = vadd.f32 %v219_v17, %v218_v16 }
  0x9b   : > { %v221_v19 = vrot.slane %v220_v18, 2 }
  0x9d   : > { %v222_v20 = vadd.f32 %v221_v19, %v220_v18 }
  0x9f   : > { %v223_v21 = vrot.slane %v222_v20, 1 }
  0xa1   : > { %v224_v22 = vadd.f32 %v223_v21, %v222_v20 }
  0xa3   : > { %v225_v23 = vmul.f32 0.125, %v224_v22 }
  0xa5   : > { %v226_v24 = vsub.f32 %v216_v15, %v225_v23 }
  0xa7   : > { %v227_v25 = vmul.f32 %v226_v24, %v226_v24 }
  0xa9   : > { %v228_v26 = vsel %vm217_vm0, %v227_v25, 0.0 }
  0xaa   : > { %v229_v27 = vrot.slane %v228_v26, 4 }
  0xac   : > { %v230_v28 = vadd.f32 %v229_v27, %v228_v26 }
  0xae   : > { %v231_v29 = vrot.slane %v230_v28, 2 }
  0xb0   : > { %v232_v30 = vadd.f32 %v231_v29, %v230_v28 }
  0xb2   : > { %v233_v31 = vrot.slane %v232_v30, 1 }
  0xb4   : > { %v234_v32 = vadd.f32 %v233_v31, %v232_v30 }
  0xb6   : > { %v235_v33 = vmul.f32 0.125, %v234_v32 }
  0xb8   : > { %v236_v34 = vadd.f32 1e-05, %v235_v33 }
  0xba   : > { %336 = vrsqrt.f32 %v236_v34 }
  0xc7   : > { %v337_v35 = vpop.eup %336 }
  0xc8   : > { %v238_v37 = vmul.f32 %v337_v35, %v226_v24 }
  0xca   : > { %v246_v38 = vmul.f32 %v320_v36, %v238_v37 }
  0xcc   : > { %v247_v39 = vsel %vm217_vm0, %v246_v38, 0.0 }
  0xcd   : > { %248 = vadd.xlane.f32.xlu1 %v247_v39 }
 0x156   : > { %v249_v41 = vpop.xlane.xlu1 %248 }
 0x157   : > { %v257_v42 = vadd.f32 %v321_v40, %v249_v41 }
 0x159   : > { %259 = vst.msk [vmem:[%s194_s28] sm:$0xff] %vm258_vm1, %v257_v42 }
 0x15a PF: > { %s16_s17 = sadd.s32 1, %s344_s17  }
 0x15b   : > { %p13_p4 = scmp.ge.s32.totalorder %s16_s17, 6  }
 0x15d   :  { %15 = sbr.rel (!%p13_p4) target bundleno = 3 (0x3), region = 66 }

</bundles_post_ra>
